<compile_context>
chip_gen: v7x
topology: tpu7x:2x2x1
jax: 0.10.0
libtpu: 0.0.40
codegen_flags: <defaults>
</compile_context>

<pallas_src>
import functools

import jax
import jax.numpy as jnp
from jax.experimental import pallas as pl
from jax.experimental.pallas import tpu as pltpu


def sl_network_kernel(x_ref, w1_ref, b1_ref, w2_ref, b2_ref, o_ref):
    # fc1 on the MXU in f32, batch-in-lanes layout:
    #   (H, S) . (Bt, S)^T  ->  (H, Bt)
    h1 = jax.lax.dot_general(
        w1_ref[...], x_ref[...],
        dimension_numbers=(((1,), (1,)), ((), ())),
        preferred_element_type=jnp.float32,
    ) + b1_ref[...]                                   # b1: (H, 1) broadcast over lanes
    # leaky_relu (slope 0.01) on full-lane vregs (VPU).
    h1 = jnp.where(h1 > 0, h1, 0.01 * h1)
    # dropout(0.2) -> identity (eval mode).
    # fc2 as a weighted sublane reduce over H (VALU adds + one XLU reduce),
    # producing a natively lane-dense (1, Bt) row; b2 is an SMEM scalar.
    out = jnp.sum(h1 * w2_ref[...], axis=0, keepdims=True) + b2_ref[0, 0]
    o_ref[...] = out[None].astype(o_ref.dtype)        # (1, 1, Bt), full lane-dense store


def prepare_sl_params(w1, b1, w2, b2):
    """One-time (model-load) repack of PyTorch-layout parameters.

    w1: (H, S), b1: (H,), w2: (1, H), b2: (1,).  Everything stays f32.
    """
    H, S = w1.shape
    return dict(
        w1=jnp.asarray(w1, jnp.float32),                   # (H, S), used as-is
        b1_c=jnp.asarray(b1, jnp.float32).reshape(H, 1),   # (H, 1) column
        w2_c=jnp.asarray(w2, jnp.float32).reshape(H, 1),   # (H, 1) column
        b2_s=jnp.asarray(b2, jnp.float32).reshape(1, 1),   # (1, 1) SMEM scalar
    )


def _round_up(n, m):
    return ((n + m - 1) // m) * m


def _choose_block_b(B):
    """Default batch-tile size.

    Small batches: one 8-aligned tile (lane density beats 2-TC sharding at this
    size).  Larger batches: split into >= 2 grid steps (v7x megacore), 128-align
    for lane-dense stores, cap at 8192 rows (VMEM use stays tiny either way).
    """
    if B <= 256:
        return max(8, _round_up(B, 8))
    return min(8192, _round_up(pl.cdiv(B, 2), 128))


@functools.partial(jax.jit, static_argnames=("block_b",))
def sl_network_forward(x, params, block_b=None):
    """x: (B, state_num) float; params from prepare_sl_params. Returns (B, 1) f32."""
    B, S = x.shape
    H = params["w1"].shape[0]

    if block_b is None:
        block_b = _choose_block_b(B)
    n_tiles = pl.cdiv(B, block_b)

    x = jnp.asarray(x, jnp.float32)   # no-op for f32 inputs: no extra HBM pass

    out = pl.pallas_call(
        sl_network_kernel,
        out_shape=jax.ShapeDtypeStruct((n_tiles, 1, block_b), jnp.float32),
        grid=(n_tiles,),
        in_specs=[
            pl.BlockSpec((block_b, S), lambda i: (i, 0)),          # x tile (partial tail OK)
            pl.BlockSpec((H, S), lambda i: (0, 0)),                # W1 (resident)
            pl.BlockSpec((H, 1), lambda i: (0, 0)),                # b1 column (resident)
            pl.BlockSpec((H, 1), lambda i: (0, 0)),                # W2 column (resident)
            pl.BlockSpec((1, 1), lambda i: (0, 0),
                         memory_space=pltpu.SMEM),                 # b2 scalar
        ],
        out_specs=pl.BlockSpec((1, 1, block_b), lambda i: (i, 0, 0)),
        compiler_params=pltpu.CompilerParams(
            dimension_semantics=("parallel",)),
    )(x, params["w1"], params["b1_c"], params["w2_c"], params["b2_s"])

    # (n_tiles, 1, block_b) -> (B, 1); padded tail lanes (garbage rows) dropped.
    return out.reshape(-1)[:B].reshape(B, 1)


def reference_forward(x, w1, b1, w2, b2):
    hi = jax.lax.Precision.HIGHEST
    h1 = jnp.dot(x, w1.T, precision=hi) + b1
    h1 = jnp.where(h1 > 0, h1, 0.01 * h1)
    return jnp.dot(h1, w2.T, precision=hi) + b2


if __name__ == "__main__":
    # Kuhn poker NFSP: small state encoding; representative sizes.
    state_num = 16
    hidden_units_num = 32

    key = jax.random.PRNGKey(0)
    kx, kw1, kb1, kw2, kb2, kx2, kx3 = jax.random.split(key, 7)

    # Deterministic, PyTorch-Linear-style uniform init.
    bound1 = 1.0 / (state_num ** 0.5)
    bound2 = 1.0 / (hidden_units_num ** 0.5)
    w1 = jax.random.uniform(kw1, (hidden_units_num, state_num),
                            minval=-bound1, maxval=bound1, dtype=jnp.float32)
    b1 = jax.random.uniform(kb1, (hidden_units_num,),
                            minval=-bound1, maxval=bound1, dtype=jnp.float32)
    w2 = jax.random.uniform(kw2, (1, hidden_units_num),
                            minval=-bound2, maxval=bound2, dtype=jnp.float32)
    b2 = jax.random.uniform(kb2, (1,),
                            minval=-bound2, maxval=bound2, dtype=jnp.float32)

    params = prepare_sl_params(w1, b1, w2, b2)

    def check(x, block_b=None):
        out = jax.block_until_ready(sl_network_forward(x, params, block_b=block_b))
        assert out.shape == (x.shape[0], 1), out.shape
        ref = reference_forward(x, w1, b1, w2, b2)
        assert jnp.allclose(out, ref, atol=2e-2, rtol=2e-2), (
            float(jnp.max(jnp.abs(out - ref))))

    # Small single-tile case (B = 8).
    x_small = jax.random.normal(kx, (8, state_num), dtype=jnp.float32)
    check(x_small)

    # Ragged batch, default tiling (single 256-row tile, partial input block).
    x_big = jax.random.normal(kx2, (250, state_num), dtype=jnp.float32)
    check(x_big)

    # Ragged batch, explicit multi-step grid (2 tiles, partial last input block).
    check(x_big, block_b=128)

    # Larger batch exercising the >=2-grid-step default path (block_b = 512).
    x_large = jax.random.normal(kx3, (1000, state_num), dtype=jnp.float32)
    check(x_large)

    print("KERNEL_OK")
</pallas_src>

<mosaic_0001>
module attributes {stable_mosaic.version = 11 : i64} {
  func.func @sl_network_kernel(%arg0: i32, %arg1: memref<8x16xf32, #tpu.memory_space<vmem>>, %arg2: memref<32x16xf32, #tpu.memory_space<vmem>>, %arg3: memref<32x1xf32, #tpu.memory_space<vmem>>, %arg4: memref<32x1xf32, #tpu.memory_space<vmem>>, %arg5: memref<1x1xf32, #tpu.memory_space<smem>>, %arg6: memref<1x1x8xf32, #tpu.memory_space<vmem>>) attributes {dimension_semantics = [#tpu.dimension_semantics<parallel>], iteration_bounds = array<i64: 1>, scalar_prefetch = 0 : i64, scratch_operands = 0 : i64, tpu.core_type = #tpu.core_type<tc>, window_params = [{transform_indices = @transform_0, window_bounds = array<i64: 8, 16>}, {pipeline_mode = #tpu.pipeline_mode<synchronous>, transform_indices = @transform_1, window_bounds = array<i64: 32, 16>}, {pipeline_mode = #tpu.pipeline_mode<synchronous>, transform_indices = @transform_2, window_bounds = array<i64: 32, 1>}, {pipeline_mode = #tpu.pipeline_mode<synchronous>, transform_indices = @transform_3, window_bounds = array<i64: 32, 1>}, {transform_indices = @transform_4, window_bounds = array<i64: 1, 1>}, {transform_indices = @transform_5, window_bounds = array<i64: 1, 1, 8>}]} {
    %c0 = arith.constant 0 : index
    %c0_0 = arith.constant 0 : index
    %0 = vector.load %arg2[%c0, %c0_0] : memref<32x16xf32, #tpu.memory_space<vmem>>, vector<32x16xf32>
    %c0_1 = arith.constant 0 : index
    %c0_2 = arith.constant 0 : index
    %1 = vector.load %arg1[%c0_1, %c0_2] : memref<8x16xf32, #tpu.memory_space<vmem>>, vector<8x16xf32>
    %cst = arith.constant dense<0.000000e+00> : vector<32x8xf32>
    %2 = tpu.matmul %0, %1, %cst {dimension_numbers = #tpu.dot_dimension_numbers<[1], [1], [0], [0], [0, 0, 1, 0], [], []>} : vector<32x16xf32>, vector<8x16xf32>, vector<32x8xf32> -> vector<32x8xf32>
    %c0_3 = arith.constant 0 : index
    %c0_4 = arith.constant 0 : index
    %3 = vector.load %arg3[%c0_3, %c0_4] : memref<32x1xf32, #tpu.memory_space<vmem>>, vector<32x1xf32>
    %4 = vector.broadcast %3 : vector<32x1xf32> to vector<32x8xf32>
    %5 = arith.addf %2, %4 : vector<32x8xf32>
    %cst_5 = arith.constant 0.000000e+00 : f32
    %6 = vector.broadcast %cst_5 : f32 to vector<32x8xf32>
    %7 = arith.cmpf ogt, %5, %6 : vector<32x8xf32>
    %cst_6 = arith.constant 0.00999999977 : f32
    %8 = vector.broadcast %cst_6 : f32 to vector<32x8xf32>
    %9 = arith.mulf %8, %5 : vector<32x8xf32>
    %10 = arith.select %7, %5, %9 : vector<32x8xi1>, vector<32x8xf32>
    %c0_7 = arith.constant 0 : index
    %c0_8 = arith.constant 0 : index
    %11 = vector.load %arg4[%c0_7, %c0_8] : memref<32x1xf32, #tpu.memory_space<vmem>>, vector<32x1xf32>
    %12 = vector.broadcast %11 : vector<32x1xf32> to vector<32x8xf32>
    %13 = arith.mulf %10, %12 : vector<32x8xf32>
    %cst_9 = arith.constant dense<0.000000e+00> : vector<8xf32>
    %14 = vector.multi_reduction <add>, %13, %cst_9 [0] : vector<32x8xf32> to vector<8xf32>
    %15 = vector.shape_cast %14 : vector<8xf32> to vector<1x8xf32>
    %c0_10 = arith.constant 0 : index
    %c0_11 = arith.constant 0 : index
    %16 = memref.load %arg5[%c0_10, %c0_11] : memref<1x1xf32, #tpu.memory_space<smem>>
    %17 = vector.broadcast %16 : f32 to vector<1x8xf32>
    %18 = arith.addf %15, %17 : vector<1x8xf32>
    %19 = vector.shape_cast %18 : vector<1x8xf32> to vector<1x1x8xf32>
    %c0_12 = arith.constant 0 : index
    %c0_13 = arith.constant 0 : index
    %c0_14 = arith.constant 0 : index
    %20 = vector.load %arg6[%c0_12, %c0_13, %c0_14] : memref<1x1x8xf32, #tpu.memory_space<vmem>>, vector<1x1x8xf32>
    tpu.vector_store %arg6[%c0_12, %c0_13, %c0_14], %19 {strides = array<i32>} : memref<1x1x8xf32, #tpu.memory_space<vmem>>, vector<1x1x8xf32>,
    return
  }
  func.func @transform_0(%arg0: i32) -> (i32, i32) {
    %c0_i32 = arith.constant 0 : i32
    %c0_i32_0 = arith.constant 0 : i32
    return %arg0, %c0_i32 : i32, i32
  }
  func.func @transform_1(%arg0: i32) -> (i32, i32) {
    %c0_i32 = arith.constant 0 : i32
    %c0_i32_0 = arith.constant 0 : i32
    %c0_i32_1 = arith.constant 0 : i32
    return %c0_i32, %c0_i32_0 : i32, i32
  }
  func.func @transform_2(%arg0: i32) -> (i32, i32) {
    %c0_i32 = arith.constant 0 : i32
    %c0_i32_0 = arith.constant 0 : i32
    %c0_i32_1 = arith.constant 0 : i32
    return %c0_i32, %c0_i32_0 : i32, i32
  }
  func.func @transform_3(%arg0: i32) -> (i32, i32) {
    %c0_i32 = arith.constant 0 : i32
    %c0_i32_0 = arith.constant 0 : i32
    %c0_i32_1 = arith.constant 0 : i32
    return %c0_i32, %c0_i32_0 : i32, i32
  }
  func.func @transform_4(%arg0: i32) -> (i32, i32) {
    %c0_i32 = arith.constant 0 : i32
    %c0_i32_0 = arith.constant 0 : i32
    %c0_i32_1 = arith.constant 0 : i32
    return %c0_i32, %c0_i32_0 : i32, i32
  }
  func.func @transform_5(%arg0: i32) -> (i32, i32, i32) {
    %c0_i32 = arith.constant 0 : i32
    %c0_i32_0 = arith.constant 0 : i32
    %c0_i32_1 = arith.constant 0 : i32
    return %arg0, %c0_i32, %c0_i32_0 : i32, i32, i32
  }
}

</mosaic_0001>

<bundles_post_ra>
// kernel: sl_network_forward.1
= control target key start
LH: loop header
LB: loop body
LE: loop exit
PB: predicated region body
PF: predicated region fallthrough
CT: control target
= control target key end

     0   :  { %vm51_vm0 = vcmask 130048   ;;  %v273_v7 = vmov 0   ;;  %s367_s0 = inlined_call_operand.vmem [shape: f32[8,16], index: 0, kind: input, shape index: {}]   ;;  %s368_s1 = inlined_call_operand.vmem [shape: f32[32,16], index: 1, kind: input, shape index: {}]   ;;  %s369_s2 = inlined_call_operand.vmem [shape: f32[32,1], index: 2, kind: input, shape index: {}]   ;;  %s370_s3 = inlined_call_operand.vmem [shape: f32[32,1], index: 3, kind: input, shape index: {}]   ;;  %s371_s4 = inlined_call_operand.<no memory space> [shape: f32[1,1], index: 4, kind: input, shape index: {}]   ;;  %s372_s5 = inlined_call_operand.hbm [shape: f32[1,1,8], index: 5, kind: output, shape index: {}]  }
   0x1   :  { %v26_v0 = vld [vmem:[%s367_s0] sm:$0xff]  ;;  %v24_v2 = vld [vmem:[%s368_s1 + $0x10] sm:$0xff]  ;;  %v23_v3 = vld [vmem:[%s368_s1 + $0x8] sm:$0xff]  ;;  %247 = vset.pattern.permute.xlu0 %v273_v7  ;;  %248 = vset.pattern.permute.xlu1 %v273_v7 }
   0x2   :  { %v22_v1 = vld [vmem:[%s368_s1] sm:$0xff]  ;;  %235 = vmatprep.subr.msk.mxu0 %vm51_vm0, %v26_v0  ;;  %243 = vmatprep.subr.msk.mxu1 %vm51_vm0, %v26_v0  ;;  %v25_v4 = vld [vmem:[%s368_s1 + $0x18] sm:$0xff]  ;;  %v29_v6 = vld [vmem:[%s369_s2 + $0x10] sm:$0xff] }
   0x3   :  { %236 = vmatpush3.xpose.msk.msra.mxu0 %vm51_vm0, %v26_v0  ;;  %244 = vmatpush3.xpose.msk.msra.mxu1 %vm51_vm0, %v26_v0  ;;  %v27_v5 = vld [vmem:[%s369_s2] sm:$0xff] }
   0x4   :  { %237 = vmatprep.mubr.msk.f32.mxu0 %vm51_vm0, %v22_v1  ;;  %240 = vmatprep.mubr.msk.f32.mxu1 %vm51_vm0, %v24_v2 }
   0x5   :  { %11 = vsyncpa [#allocation4], 0  ;;  %33 = vperm.xlu0 %247, %v27_v5   ;;  %43 = vperm.xlu1 %248, %v29_v6   ;;  %v28_v8 = vld [vmem:[%s369_s2 + $0x8] sm:$0xff]  ;;  %v30_v9 = vld [vmem:[%s369_s2 + $0x18] sm:$0xff]  ;;  %vm192_vm5 = vcmask 64512   ;;  %v207_v54 = vstv %s371_s4  ;;  %s274_s17 = smov [#allocation3]  }
   0x6   :  { %238 = vmatmul.mubr.msk.f32.vlgmr.msra.gmra.mrb[0].mxu0 %vm51_vm0, %v23_v3  ;;  %241 = vmatmul.mubr.msk.f32.vlgmr.msra.gmra.mrb[0].mxu1 %vm51_vm0, %v25_v4  ;;  %v164_v10 = vld [vmem:[%s370_s3] sm:$0xff]  ;;  %v165_v11 = vld [vmem:[%s370_s3 + $0x8] sm:$0xff]  ;;  %v166_v12 = vld [vmem:[%s370_s3 + $0x10] sm:$0xff]  ;;  %s217_s18 = sshll.u32 %s274_s17, 4  ;;  %vm209_vm6 = vcmask 57344   ;;  %s218_s18 = int_to_ptr.vmem [resolvable:$true] %s217_s18 }
   0x7   :  { %v167_v13 = vld [vmem:[%s370_s3 + $0x18] sm:$0xff]  ;;  %s249_s19 = scalar_lea.vmem %s218_s18, 16  ;;  %s253_s20 = scalar_lea.vmem %s218_s18, 32 }
   0x8   :  { %p250_p0 = scmp.ne.s32.totalorder %s218_s18, %s249_s19  ;;  %p254_p1 = scmp.lt.s32.totalorder %s218_s18, %s218_s18 }
   0x9   :  { %38 = vperm.xlu0 %247, %v28_v8   ;;  %48 = vperm.xlu1 %248, %v30_v9   ;;  %p255_p2 = scmp.lt.s32.totalorder %s253_s20, %s249_s19 }
   0xb   :  { %p256_p3 = por %p255_p2, %p254_p1 }
   0xd   :  { %170 = vperm.xlu0 %247, %v164_v10   ;;  %175 = vperm.xlu1 %248, %v165_v11   ;;  %p257_p4 = pnand %p256_p3, %p250_p0 }
  0x11   :  { %180 = vperm.xlu0 %247, %v166_v12   ;;  %185 = vperm.xlu1 %248, %v167_v13  }
  0x84   :  { %v34_v14 = vpop.permute.xlu0 %33  ;;  %v44_v15 = vpop.permute.xlu1 %43 }
  0x88   :  { %v39_v16 = vpop.permute.xlu0 %38  ;;  %v49_v17 = vpop.permute.xlu1 %48 }
  0x8c   :  { %v171_v18 = vpop.permute.xlu0 %170  ;;  %v176_v25 = vpop.permute.xlu1 %175 }
  0x90   :  { %v181_v33 = vpop.permute.xlu0 %180  ;;  %v186_v40 = vpop.permute.xlu1 %185 }
  0xd9   :  { %v239_v19 = vpop.f32.mrb[0].mxu0  ;;  %v242_v20 = vpop.f32.mrb[0].mxu1 }
  0xda   :  { %v139_v21 = vadd.f32 %v239_v19, %v39_v16  ;;  %v149_v22 = vadd.f32 %v242_v20, %v49_v17  ;;  %v133_v23 = vpop.f32.mrb[1].mxu0  ;;  %v143_v24 = vpop.f32.mrb[1].mxu1 }
  0xdb   :  { %v134_v26 = vadd.f32 %v133_v23, %v34_v14  ;;  %v144_v27 = vadd.f32 %v143_v24, %v44_v15 }
  0xdc   :  { %vm153_vm1 = vcmp.gt.f32.partialorder %v139_v21, 0.0  ;;  %v157_v28 = vmul.f32 0.01, %v139_v21  ;;  %vm155_vm2 = vcmp.gt.f32.partialorder %v149_v22, 0.0  ;;  %v159_v29 = vmul.f32 0.01, %v149_v22 }
  0xdd   :  { %vm152_vm3 = vcmp.gt.f32.partialorder %v134_v26, 0.0  ;;  %v156_v30 = vmul.f32 0.01, %v134_v26  ;;  %vm154_vm4 = vcmp.gt.f32.partialorder %v144_v27, 0.0  ;;  %v158_v31 = vmul.f32 0.01, %v144_v27 }
  0xde   :  { %v161_v32 = vsel %vm153_vm1, %v139_v21, %v157_v28  ;;  %v163_v35 = vsel %vm155_vm2, %v149_v22, %v159_v29 }
  0xdf   :  { %v189_v34 = vmul.f32 %v176_v25, %v161_v32  ;;  %v160_v36 = vsel %vm152_vm3, %v134_v26, %v156_v30  ;;  %v162_v37 = vsel %vm154_vm4, %v144_v27, %v158_v31  ;;  %v191_v42 = vmul.f32 %v186_v40, %v163_v35 }
  0xe0   :  { %v188_v38 = vmul.f32 %v171_v18, %v160_v36  ;;  %v190_v39 = vmul.f32 %v181_v33, %v162_v37 }
  0xe1   :  { %v194_v41 = vsel %vm192_vm5, %v189_v34, 0.0  ;;  %v198_v47 = vsel %vm192_vm5, %v191_v42, 0.0 }
  0xe2   :  { %v193_v43 = vsel %vm192_vm5, %v188_v38, 0.0  ;;  %v196_v45 = vsel %vm192_vm5, %v190_v39, 0.0 }
  0xe3   :  { %v195_v44 = vadd.f32 %v194_v41, %v193_v43 }
  0xe5   :  { %v197_v46 = vadd.f32 %v196_v45, %v195_v44 }
  0xe7   :  { %v199_v48 = vadd.f32 %v198_v47, %v197_v46 }
  0xe9   :  { %v200_v49 = vrot.slane %v199_v48, 4 }
  0xeb   :  { %v201_v50 = vadd.f32 %v200_v49, %v199_v48 }
  0xed   :  { %v202_v51 = vrot.slane %v201_v50, 2 }
  0xef   :  { %v203_v52 = vadd.f32 %v202_v51, %v201_v50 }
  0xf1   :  { %v204_v53 = vrot.slane %v203_v52, 1 }
  0xf3   :  { %v205_v55 = vadd.f32 %v204_v53, %v203_v52 }
  0xf5   :  { %v208_v56 = vadd.f32 %v207_v54, %v205_v55 }
  0xf7   :  { %210 = vst.msk [vmem:[#allocation3] sm:$0x1] %vm209_vm6, %v208_v56 }
  0xf8   :  { %260 = shalt.err (!%p257_p4)
}
  0xf9   :  { %s261_s23 = scalar_lea.hbm %s372_s5, 16 }
  0xfa   :  { %p262_p5 = scmp.ne.s32.totalorder %s372_s5, %s261_s23  ;;  %p265_p6 = scmp.lt.u32.totalorder %s261_s23, %s372_s5 }
  0xfc   :  { %p267_p7 = pnand %p265_p6, %p262_p5 }
  0xfe   :  { %270 = shalt.err (!%p267_p7)
}
  0xff   :  { %220 = dma.vmem_to_hbm [thread:$0]  %s218_s18, 16, %s372_s5, [#allocation4]  }
 0x100   :  { %271 = dma.done.wait [#allocation4], 16  }
 0x101   :  { %272 = vsyncadd [#allocation4], 4294967280 }
 0x102   :  { %224 = vsyncpa [#allocation4], 1 }

</bundles_post_ra>
